<compile_context>
chip_gen: v6e
topology: v6e:2x2x1
jax: 0.10.0
libtpu: 0.0.40
codegen_flags: <defaults>
</compile_context>

<pallas_src>
import math

import jax
import jax.numpy as jnp
from jax.experimental import pallas as pl
from jax.experimental.pallas import tpu as pltpu

# nn.LeakyReLU(True) -> negative_slope == True == 1.0 (identity activation).
NEG_SLOPE = 1.0


def _folded_kernel(x_ref, w_ref, b_ref, out_ref):
    """sigmoid(x @ W_blockdiag + b) for one tile of packed rows.

    x_ref  : (tile_m, C)     VMEM, C = pack * n (multiple of 128, lane-dense)
    w_ref  : (C, pack)       VMEM, resident across grid steps
    b_ref  : (1, 1)          SMEM scalar (folded bias)
    out_ref: (tile_m, pack)  VMEM
    """
    logits = jnp.dot(x_ref[...], w_ref[...],
                     preferred_element_type=jnp.float32) + b_ref[0, 0]
    den = jnp.exp(-logits) + 1.0                       # EUP exp + one VALU add
    out_ref[...] = pl.reciprocal(den, approx=True).astype(out_ref.dtype)


def discriminator_forward(d, params):
    """d: (B, win_size, input_c) float32 -> validity (B, 1) in [0, 1]."""
    B = d.shape[0]
    n = int(math.prod(d.shape[1:]))
    w1, b1, w2, b2, w3, b3 = params

    # Identity activations -> fold the three affine layers into one matvec.
    assert NEG_SLOPE == 1.0, "folded path assumes LeakyReLU(True) == identity"
    w = (w1 @ w2) @ w3                                 # (n, 1)
    b = ((b1 @ w2 + b2) @ w3 + b3).astype(jnp.float32)  # (1, 1) scalar bias

    # ---- repack so the lane dim is a multiple of 128 ----------------------
    pack = 128 // math.gcd(n, 128)        # min samples/row for dense lanes
    while pack < 32 and pack * n < 2048:  # widen output lanes while cheap
        pack *= 2
    C = pack * n                          # lanes per packed row (mult. of 128)
    M = -(-B // pack)                     # packed rows (ceil)
    B_pad = M * pack

    x_flat = d.reshape(-1)                # row-major flatten == torch .view
    if B_pad != B:
        x_flat = jnp.pad(x_flat, (0, (B_pad - B) * n))
    x = x_flat.reshape(M, C)              # densest possible HBM layout

    # Block-diagonal folded weight: column j applies w to sample j of each row.
    w_big = jnp.kron(jnp.eye(pack, dtype=jnp.float32), w.astype(jnp.float32))

    # ---- tile selection: VMEM budget + >=2 grid steps for v7x megacore ----
    x_buf_budget = 8 * 1024 * 1024                       # 2 double-buffered x blocks
    tile_budget = max(8, (x_buf_budget // (2 * C * 4)) // 8 * 8)
    if M > tile_budget:
        tile_m = tile_budget
    elif M >= 16:
        tile_m = ((-(-M // 2)) + 7) // 8 * 8             # split -> >=2 grid steps
    else:
        tile_m = M                                       # full-dim block (legal)
    grid = (pl.cdiv(M, tile_m),)

    cost = pl.CostEstimate(
        flops=2 * M * C * pack,
        transcendentals=2 * M * pack,                    # exp + approx recip
        bytes_accessed=M * C * 4 + M * pack * 4 + C * pack * 4 + 4,
    )
    cparams = pltpu.CompilerParams(
        dimension_semantics=("parallel",),
        vmem_limit_bytes=32 * 1024 * 1024,
    )

    out = pl.pallas_call(
        _folded_kernel,
        out_shape=jax.ShapeDtypeStruct((M, pack), jnp.float32),
        grid=grid,
        in_specs=[
            pl.BlockSpec((tile_m, C), lambda i: (i, 0)),          # pipelined x
            pl.BlockSpec((C, pack), lambda i: (0, 0)),            # resident weight
            pl.BlockSpec(memory_space=pltpu.MemorySpace.SMEM),    # scalar bias
        ],
        out_specs=pl.BlockSpec((tile_m, pack), lambda i: (i, 0)),
        compiler_params=cparams,
        cost_estimate=cost,
    )(x, w_big, b)

    # (M, pack) row-major is exactly sample order; trivial 4*B-byte reshape.
    return out.reshape(B_pad, 1)[:B]


def init_params(key, win_size, input_c, n_hidden=16):
    """Deterministic synthetic init (PyTorch-Linear-style uniform bounds)."""
    n = win_size * input_c
    ks = jax.random.split(key, 6)

    def lin(kw, kb, fan_in, fan_out):
        bound = 1.0 / math.sqrt(float(fan_in))
        w = jax.random.uniform(kw, (fan_in, fan_out), jnp.float32, -bound, bound)
        b = jax.random.uniform(kb, (1, fan_out), jnp.float32, -bound, bound)
        return w, b

    w1, b1 = lin(ks[0], ks[1], n, n_hidden)
    w2, b2 = lin(ks[2], ks[3], n_hidden, n_hidden)
    w3, b3 = lin(ks[4], ks[5], n_hidden, 1)
    return (w1, b1, w2, b2, w3, b3)


def reference_forward(d, params):
    """Pure-JAX layer-by-layer reference for correctness checking."""
    w1, b1, w2, b2, w3, b3 = params
    x = d.reshape(d.shape[0], -1)

    def act(h):
        return jnp.where(h >= 0, h, NEG_SLOPE * h)

    h1 = act(x @ w1 + b1)
    h2 = act(h1 @ w2 + b2)
    return jax.nn.sigmoid(h2 @ w3 + b3)


if __name__ == "__main__":
    # Small shapes consistent with the module: win_size=8, input_c=4 -> n=32.
    win_size, input_c = 8, 4

    key = jax.random.PRNGKey(0)
    k_params, k0, k1, k2 = jax.random.split(key, 4)
    params = init_params(k_params, win_size, input_c)

    # approx reciprocal (EUP vrcp) in the epilogue -> relaxed tolerance.
    tol = dict(atol=5e-3, rtol=5e-3)

    # B=64  : no padding, single grid step.
    # B=40  : exercises the pad-to-pack path + output slicing.
    # B=512 : exercises the multi-tile pipelined grid (2 steps -> v7x megacore).
    for kd, B in zip((k0, k1, k2), (64, 40, 512)):
        d = jax.random.normal(kd, (B, win_size, input_c), dtype=jnp.float32)
        out = jax.block_until_ready(discriminator_forward(d, params))
        ref = reference_forward(d, params)
        assert out.shape == (B, 1)
        assert jnp.allclose(out, ref, **tol), (
            B, float(jnp.max(jnp.abs(out - ref))))

    print("KERNEL_OK")
</pallas_src>

<mosaic_0001>
module attributes {stable_mosaic.version = 11 : i64} {
  func.func @_folded_kernel(%arg0: i32, %arg1: memref<2x1024xf32, #tpu.memory_space<vmem>>, %arg2: memref<1024x32xf32, #tpu.memory_space<vmem>>, %arg3: memref<1x1xf32, #tpu.memory_space<smem>>, %arg4: memref<2x32xf32, #tpu.memory_space<vmem>>) attributes {dimension_semantics = [#tpu.dimension_semantics<parallel>], iteration_bounds = array<i64: 1>, scalar_prefetch = 0 : i64, scratch_operands = 0 : i64, tpu.core_type = #tpu.core_type<tc>, window_params = [{transform_indices = @transform_0, window_bounds = array<i64: 2, 1024>}, {pipeline_mode = #tpu.pipeline_mode<synchronous>, transform_indices = @transform_1, window_bounds = array<i64: 1024, 32>}, {transform_indices = @transform_2, window_bounds = array<i64: 1, 1>}, {transform_indices = @transform_3, window_bounds = array<i64: 2, 32>}]} {
    %c0 = arith.constant 0 : index
    %c0_0 = arith.constant 0 : index
    %0 = vector.load %arg1[%c0, %c0_0] : memref<2x1024xf32, #tpu.memory_space<vmem>>, vector<2x1024xf32>
    %c0_1 = arith.constant 0 : index
    %c0_2 = arith.constant 0 : index
    %1 = vector.load %arg2[%c0_1, %c0_2] : memref<1024x32xf32, #tpu.memory_space<vmem>>, vector<1024x32xf32>
    %cst = arith.constant dense<0.000000e+00> : vector<2x32xf32>
    %2 = tpu.matmul %0, %1, %cst {dimension_numbers = #tpu.dot_dimension_numbers<[1], [0], [0], [1], [0, 0, 1, 1], [], []>} : vector<2x1024xf32>, vector<1024x32xf32>, vector<2x32xf32> -> vector<2x32xf32>
    %c0_3 = arith.constant 0 : index
    %c0_4 = arith.constant 0 : index
    %3 = memref.load %arg3[%c0_3, %c0_4] : memref<1x1xf32, #tpu.memory_space<smem>>
    %4 = vector.broadcast %3 : f32 to vector<2x32xf32>
    %5 = arith.addf %2, %4 : vector<2x32xf32>
    %cst_5 = arith.constant 0.000000e+00 : f32
    %6 = vector.broadcast %cst_5 : f32 to vector<2x32xf32>
    %7 = arith.subf %6, %5 : vector<2x32xf32>
    %8 = math.exp %7 : vector<2x32xf32>
    %cst_6 = arith.constant 1.000000e+00 : f32
    %9 = vector.broadcast %cst_6 : f32 to vector<2x32xf32>
    %10 = arith.addf %8, %9 : vector<2x32xf32>
    %11 = tpu.reciprocal %10 {approx = true} : vector<2x32xf32> -> vector<2x32xf32>
    %c0_7 = arith.constant 0 : index
    %c0_8 = arith.constant 0 : index
    %12 = vector.load %arg4[%c0_7, %c0_8] : memref<2x32xf32, #tpu.memory_space<vmem>>, vector<2x32xf32>
    tpu.vector_store %arg4[%c0_7, %c0_8], %11 {strides = array<i32>} : memref<2x32xf32, #tpu.memory_space<vmem>>, vector<2x32xf32>,
    return
  }
  func.func @transform_0(%arg0: i32) -> (i32, i32) {
    %c0_i32 = arith.constant 0 : i32
    %c0_i32_0 = arith.constant 0 : i32
    return %arg0, %c0_i32 : i32, i32
  }
  func.func @transform_1(%arg0: i32) -> (i32, i32) {
    %c0_i32 = arith.constant 0 : i32
    %c0_i32_0 = arith.constant 0 : i32
    %c0_i32_1 = arith.constant 0 : i32
    return %c0_i32, %c0_i32_0 : i32, i32
  }
  func.func @transform_2(%arg0: i32) -> (i32, i32) {
    %c0_i32 = arith.constant 0 : i32
    %c0_i32_0 = arith.constant 0 : i32
    %c0_i32_1 = arith.constant 0 : i32
    return %c0_i32, %c0_i32_0 : i32, i32
  }
  func.func @transform_3(%arg0: i32) -> (i32, i32) {
    %c0_i32 = arith.constant 0 : i32
    %c0_i32_0 = arith.constant 0 : i32
    return %arg0, %c0_i32 : i32, i32
  }
}

</mosaic_0001>

<bundles_post_ra>
// kernel: tpu_custom_call.1
= control target key start
LH: loop header
LB: loop body
LE: loop exit
PB: predicated region body
PF: predicated region fallthrough
CT: control target
= control target key end

     0   :  { %v663_v30 = vmov 1983009808   ;;  %v154_v32 = vlaneseq  ;;  %s1087_s0 = inlined_call_operand.vmem [shape: f32[2,1024], index: 0, kind: input, shape index: {}]   ;;  %s1088_s1 = inlined_call_operand.vmem [shape: f32[1024,32], index: 1, kind: input, shape index: {}]   ;;  %s1089_s2 = inlined_call_operand.<no memory space> [shape: f32[1,1], index: 2, kind: input, shape index: {}]   ;;  %s1090_s3 = inlined_call_operand.hbm [shape: f32[2,32], index: 3, kind: output, shape index: {}]  }
   0x1   :  { %v49_v0 = vld [vmem:[%s1088_s1 + $0xf8] sm:$0xff]  ;;  %v48_v4 = vld [vmem:[%s1088_s1 + $0xf0] sm:$0xff]  ;;  %v47_v8 = vld [vmem:[%s1088_s1 + $0xe8] sm:$0xff]  ;;  %v152_v31 = vunpack.c.l.s4 %v663_v30 }
   0x2   :  { %v81_v1 = vld [vmem:[%s1088_s1 + $0x1f8] sm:$0xff]  ;;  %493 = vmatprep.subr.mxu0 %v49_v0  ;;  %v80_v5 = vld [vmem:[%s1088_s1 + $0x1f0] sm:$0xff]  ;;  %v79_v9 = vld [vmem:[%s1088_s1 + $0x1e8] sm:$0xff]  ;;  %v155_v42 = vshrl.u32 %v154_v32, 7 }
   0x3   :  { %v33_v2 = vld [vmem:[%s1088_s1 + $0x78] sm:$0xff]  ;;  %528 = vmatprep.subr.mxu1 %v81_v1  ;;  %v32_v6 = vld [vmem:[%s1088_s1 + $0x70] sm:$0xff]  ;;  %v31_v10 = vld [vmem:[%s1088_s1 + $0x68] sm:$0xff]  ;;  %v153_v41 = vunpack.c.0.s8 %v152_v31 }
   0x4   :  { %v65_v3 = vld [vmem:[%s1088_s1 + $0x178] sm:$0xff]  ;;  %494 = vmatpush3.msra.mxu0 %v33_v2  ;;  %v64_v7 = vld [vmem:[%s1088_s1 + $0x170] sm:$0xff]  ;;  %v63_v11 = vld [vmem:[%s1088_s1 + $0x168] sm:$0xff] }
   0x5   :  { %529 = vmatpush3.msra.mxu1 %v65_v3  ;;  %495 = vmatprep.subr.mxu0 %v48_v4  ;;  %v46_v12 = vld [vmem:[%s1088_s1 + $0xe0] sm:$0xff]  ;;  %v45_v16 = vld [vmem:[%s1088_s1 + $0xd8] sm:$0xff]  ;;  %v44_v20 = vld [vmem:[%s1088_s1 + $0xd0] sm:$0xff]  ;;  %v823_v51 = vsub.s32 %v153_v41, %v155_v42 }
   0x6   :  { %530 = vmatprep.subr.mxu1 %v80_v5  ;;  %496 = vmatpush3.msra.mxu0 %v32_v6  ;;  %v78_v13 = vld [vmem:[%s1088_s1 + $0x1e0] sm:$0xff]  ;;  %v77_v17 = vld [vmem:[%s1088_s1 + $0x1d8] sm:$0xff]  ;;  %v76_v21 = vld [vmem:[%s1088_s1 + $0x1d0] sm:$0xff] }
   0x7   :  { %531 = vmatpush3.msra.mxu1 %v64_v7  ;;  %497 = vmatprep.subr.mxu0 %v47_v8  ;;  %v30_v14 = vld [vmem:[%s1088_s1 + $0x60] sm:$0xff]  ;;  %v29_v18 = vld [vmem:[%s1088_s1 + $0x58] sm:$0xff]  ;;  %v28_v22 = vld [vmem:[%s1088_s1 + $0x50] sm:$0xff] }
   0x8   :  { %532 = vmatprep.subr.mxu1 %v79_v9  ;;  %v62_v15 = vld [vmem:[%s1088_s1 + $0x160] sm:$0xff]  ;;  %498 = vmatpush3.msra.mxu0 %v31_v10  ;;  %v61_v19 = vld [vmem:[%s1088_s1 + $0x158] sm:$0xff]  ;;  %v60_v23 = vld [vmem:[%s1088_s1 + $0x150] sm:$0xff] }
   0x9   :  { %533 = vmatpush3.msra.mxu1 %v63_v11  ;;  %499 = vmatprep.subr.mxu0 %v46_v12  ;;  %v43_v24 = vld [vmem:[%s1088_s1 + $0xc8] sm:$0xff]  ;;  %v42_v28 = vld [vmem:[%s1088_s1 + $0xc0] sm:$0xff]  ;;  %v41_v35 = vld [vmem:[%s1088_s1 + $0xb8] sm:$0xff] }
   0xa   :  { %534 = vmatprep.subr.mxu1 %v78_v13  ;;  %500 = vmatpush3.msra.mxu0 %v30_v14  ;;  %v75_v25 = vld [vmem:[%s1088_s1 + $0x1c8] sm:$0xff]  ;;  %v74_v29 = vld [vmem:[%s1088_s1 + $0x1c0] sm:$0xff]  ;;  %v73_v36 = vld [vmem:[%s1088_s1 + $0x1b8] sm:$0xff] }
   0xb   :  { %535 = vmatpush3.msra.mxu1 %v62_v15  ;;  %501 = vmatprep.subr.mxu0 %v45_v16  ;;  %v27_v26 = vld [vmem:[%s1088_s1 + $0x48] sm:$0xff]  ;;  %v26_v33 = vld [vmem:[%s1088_s1 + $0x40] sm:$0xff]  ;;  %v25_v37 = vld [vmem:[%s1088_s1 + $0x38] sm:$0xff] }
   0xc   :  { %536 = vmatprep.subr.mxu1 %v77_v17  ;;  %502 = vmatpush3.msra.mxu0 %v29_v18  ;;  %v59_v27 = vld [vmem:[%s1088_s1 + $0x148] sm:$0xff]  ;;  %v58_v34 = vld [vmem:[%s1088_s1 + $0x140] sm:$0xff]  ;;  %v57_v38 = vld [vmem:[%s1088_s1 + $0x138] sm:$0xff] }
   0xd   :  { %537 = vmatpush3.msra.mxu1 %v61_v19  ;;  %503 = vmatprep.subr.mxu0 %v44_v20  ;;  %v40_v39 = vld [vmem:[%s1088_s1 + $0xb0] sm:$0xff]  ;;  %v39_v45 = vld [vmem:[%s1088_s1 + $0xa8] sm:$0xff]  ;;  %v38_v49 = vld [vmem:[%s1088_s1 + $0xa0] sm:$0xff] }
   0xe   :  { %538 = vmatprep.subr.mxu1 %v76_v21  ;;  %504 = vmatpush3.msra.mxu0 %v28_v22  ;;  %v72_v40 = vld [vmem:[%s1088_s1 + $0x1b0] sm:$0xff]  ;;  %v71_v46 = vld [vmem:[%s1088_s1 + $0x1a8] sm:$0xff]  ;;  %v70_v50 = vld [vmem:[%s1088_s1 + $0x1a0] sm:$0xff] }
   0xf   :  { %539 = vmatpush3.msra.mxu1 %v60_v23  ;;  %505 = vmatprep.subr.mxu0 %v43_v24  ;;  %v24_v43 = vld [vmem:[%s1088_s1 + $0x30] sm:$0xff]  ;;  %v23_v47 = vld [vmem:[%s1088_s1 + $0x28] sm:$0xff]  ;;  %v22_v52 = vld [vmem:[%s1088_s1 + $0x20] sm:$0xff] }
  0x10   :  { %540 = vmatprep.subr.mxu1 %v75_v25  ;;  %506 = vmatpush3.msra.mxu0 %v27_v26  ;;  %v56_v44 = vld [vmem:[%s1088_s1 + $0x130] sm:$0xff]  ;;  %v55_v48 = vld [vmem:[%s1088_s1 + $0x128] sm:$0xff]  ;;  %v54_v53 = vld [vmem:[%s1088_s1 + $0x120] sm:$0xff] }
  0x11   :  { %541 = vmatpush3.msra.mxu1 %v59_v27  ;;  %507 = vmatprep.subr.mxu0 %v42_v28  ;;  %v16_v54 = vld [vmem:[%s1087_s0] sm:$0xff]  ;;  %v37_v55 = vld [vmem:[%s1088_s1 + $0x98] sm:$0xff]  ;;  %v36_v60 = vld [vmem:[%s1088_s1 + $0x90] sm:$0xff] }
  0x12   :  { %542 = vmatprep.subr.mxu1 %v74_v29  ;;  %508 = vmatpush3.msra.mxu0 %v26_v33  ;;  %v69_v56 = vld [vmem:[%s1088_s1 + $0x198] sm:$0xff]  ;;  %v150_v57 = vcombine.high %v16_v54, %v16_v54  ;;  %v68_v61 = vld [vmem:[%s1088_s1 + $0x190] sm:$0xff]  ;;  %v157_v62 = vrot.slane %v16_v54, %v823_v51  ;;  %v35_v1 = vld [vmem:[%s1088_s1 + $0x88] sm:$0xff] }
  0x13   :  { %543 = vmatpush3.msra.mxu1 %v58_v34  ;;  %509 = vmatprep.subr.mxu0 %v41_v35  ;;  %v21_v58 = vld [vmem:[%s1088_s1 + $0x18] sm:$0xff]  ;;  %v20_v63 = vld [vmem:[%s1088_s1 + $0x10] sm:$0xff]  ;;  %v67_v2 = vld [vmem:[%s1088_s1 + $0x188] sm:$0xff] }
  0x14   :  { %544 = vmatprep.subr.mxu1 %v73_v36  ;;  %510 = vmatpush3.msra.mxu0 %v25_v37  ;;  %v53_v59 = vld [vmem:[%s1088_s1 + $0x118] sm:$0xff]  ;;  %v52_v0 = vld [vmem:[%s1088_s1 + $0x110] sm:$0xff]  ;;  %v164_v3 = vrot.slane %v150_v57, %v823_v51  ;;  %v19_v4 = vld [vmem:[%s1088_s1 + $0x8] sm:$0xff]  ;;  %v165_v8 = vcombine.high %v157_v62, %v157_v62 }
  0x15   :  { %545 = vmatpush3.msra.mxu1 %v57_v38  ;;  %511 = vmatprep.subr.mxu0 %v40_v39  ;;  %v51_v5 = vld [vmem:[%s1088_s1 + $0x108] sm:$0xff]  ;;  %v34_v6 = vld [vmem:[%s1088_s1 + $0x80] sm:$0xff]  ;;  %v113_v12 = vld [vmem:[%s1088_s1 + $0x2f8] sm:$0xff] }
  0x16   :  { %546 = vmatprep.subr.mxu1 %v72_v40  ;;  %512 = vmatpush3.msra.mxu0 %v24_v43  ;;  %v66_v7 = vld [vmem:[%s1088_s1 + $0x180] sm:$0xff]  ;;  %v166_v11 = vcombine.high %v164_v3, %v164_v3  ;;  %v145_v13 = vld [vmem:[%s1088_s1 + $0x3f8] sm:$0xff]  ;;  %v112_v16 = vld [vmem:[%s1088_s1 + $0x2f0] sm:$0xff] }
  0x17   :  { %547 = vmatpush3.msra.mxu1 %v56_v44  ;;  %513 = vmatprep.subr.mxu0 %v39_v45  ;;  %v18_v9 = vld [vmem:[%s1088_s1] sm:$0xff]  ;;  %v97_v14 = vld [vmem:[%s1088_s1 + $0x278] sm:$0xff]  ;;  %v144_v17 = vld [vmem:[%s1088_s1 + $0x3f0] sm:$0xff] }
  0x18   :  { %548 = vmatprep.subr.mxu1 %v71_v46  ;;  %514 = vmatpush3.msra.mxu0 %v23_v47  ;;  %v50_v10 = vld [vmem:[%s1088_s1 + $0x100] sm:$0xff]  ;;  %v129_v15 = vld [vmem:[%s1088_s1 + $0x378] sm:$0xff]  ;;  %v96_v18 = vld [vmem:[%s1088_s1 + $0x270] sm:$0xff] }
  0x19   :  { %549 = vmatpush3.msra.mxu1 %v55_v48  ;;  %515 = vmatprep.subr.mxu0 %v38_v49  ;;  %v128_v19 = vld [vmem:[%s1088_s1 + $0x370] sm:$0xff]  ;;  %v111_v20 = vld [vmem:[%s1088_s1 + $0x2e8] sm:$0xff]  ;;  %v110_v24 = vld [vmem:[%s1088_s1 + $0x2e0] sm:$0xff] }
  0x1a   :  { %550 = vmatprep.subr.mxu1 %v70_v50  ;;  %516 = vmatpush3.msra.mxu0 %v22_v52  ;;  %v143_v21 = vld [vmem:[%s1088_s1 + $0x3e8] sm:$0xff]  ;;  %v142_v25 = vld [vmem:[%s1088_s1 + $0x3e0] sm:$0xff]  ;;  %v109_v28 = vld [vmem:[%s1088_s1 + $0x2d8] sm:$0xff] }
  0x1b   :  { %551 = vmatpush3.msra.mxu1 %v54_v53  ;;  %517 = vmatprep.subr.mxu0 %v37_v55  ;;  %v95_v22 = vld [vmem:[%s1088_s1 + $0x268] sm:$0xff]  ;;  %v94_v26 = vld [vmem:[%s1088_s1 + $0x260] sm:$0xff]  ;;  %v141_v29 = vld [vmem:[%s1088_s1 + $0x3d8] sm:$0xff] }
  0x1c   :  { %552 = vmatprep.subr.mxu1 %v69_v56  ;;  %518 = vmatpush3.msra.mxu0 %v21_v58  ;;  %v127_v23 = vld [vmem:[%s1088_s1 + $0x368] sm:$0xff]  ;;  %v126_v27 = vld [vmem:[%s1088_s1 + $0x360] sm:$0xff]  ;;  %v93_v30 = vld [vmem:[%s1088_s1 + $0x258] sm:$0xff] }
  0x1d   :  { %553 = vmatpush3.msra.mxu1 %v53_v59  ;;  %519 = vmatprep.subr.mxu0 %v36_v60  ;;  %v125_v31 = vld [vmem:[%s1088_s1 + $0x358] sm:$0xff]  ;;  %v108_v32 = vld [vmem:[%s1088_s1 + $0x2d0] sm:$0xff] }
  0x1e   :  { %554 = vmatprep.subr.mxu1 %v68_v61  ;;  %520 = vmatpush3.msra.mxu0 %v20_v63  ;;  %v140_v33 = vld [vmem:[%s1088_s1 + $0x3d0] sm:$0xff] }
  0x1f   :  { %555 = vmatpush3.msra.mxu1 %v52_v0  ;;  %521 = vmatprep.subr.mxu0 %v35_v1  ;;  %v92_v34 = vld [vmem:[%s1088_s1 + $0x250] sm:$0xff] }
  0x20   :  { %556 = vmatprep.subr.mxu1 %v67_v2  ;;  %522 = vmatpush3.msra.mxu0 %v19_v4  ;;  %v124_v35 = vld [vmem:[%s1088_s1 + $0x350] sm:$0xff] }
  0x21   :  { %557 = vmatpush3.msra.mxu1 %v51_v5  ;;  %523 = vmatprep.subr.mxu0 %v34_v6 }
  0x22   :  { %558 = vmatprep.subr.mxu1 %v66_v7  ;;  %524 = vmatpush3.msra.mxu0 %v18_v9 }
  0x23   :  { %256 = vmatprep.mubr.f32.mxu0 %v165_v8  ;;  %559 = vmatpush3.msra.mxu1 %v50_v10 }
  0x24   :  { %257 = vmatmul.mubr.f32.vlgmr.msra.gmra.mxu0 %v157_v62  ;;  %326 = vmatprep.mubr.f32.mxu1 %v166_v11 }
  0x25   :  { %563 = vmatprep.subr.mxu0 %v113_v12  ;;  %598 = vmatprep.subr.mxu1 %v145_v13 }
  0x26   :  { %327 = vmatmul.mubr.f32.vlgmr.msra.gmra.mxu1 %v164_v3  ;;  %564 = vmatpush3.msra.mxu0 %v97_v14 }
  0x27   :  { %599 = vmatpush3.msra.mxu1 %v129_v15  ;;  %565 = vmatprep.subr.mxu0 %v112_v16 }
  0x28   :  { %600 = vmatprep.subr.mxu1 %v144_v17  ;;  %566 = vmatpush3.msra.mxu0 %v96_v18 }
  0x29   :  { %601 = vmatpush3.msra.mxu1 %v128_v19  ;;  %567 = vmatprep.subr.mxu0 %v111_v20 }
  0x2a   :  { %602 = vmatprep.subr.mxu1 %v143_v21  ;;  %568 = vmatpush3.msra.mxu0 %v95_v22 }
  0x2b   :  { %603 = vmatpush3.msra.mxu1 %v127_v23  ;;  %569 = vmatprep.subr.mxu0 %v110_v24 }
  0x2c   :  { %604 = vmatprep.subr.mxu1 %v142_v25  ;;  %570 = vmatpush3.msra.mxu0 %v94_v26 }
  0x2d   :  { %605 = vmatpush3.msra.mxu1 %v126_v27  ;;  %571 = vmatprep.subr.mxu0 %v109_v28 }
  0x2e   :  { %606 = vmatprep.subr.mxu1 %v141_v29 }
  0x2f   :  { %9 = vsyncpa [#allocation4], 0  ;;  %572 = vmatpush3.msra.mxu0 %v93_v30  ;;  %607 = vmatpush3.msra.mxu1 %v125_v31  ;;  %v107_v36 = vld [vmem:[%s1088_s1 + $0x2c8] sm:$0xff]  ;;  %v106_v40 = vld [vmem:[%s1088_s1 + $0x2c0] sm:$0xff]  ;;  %v147_v22 = vstv %s1089_s2  ;;  %vm477_vm0 = vcmask 254976  }
  0x30   :  { %v139_v37 = vld [vmem:[%s1088_s1 + $0x3c8] sm:$0xff]  ;;  %573 = vmatprep.subr.mxu0 %v108_v32  ;;  %608 = vmatprep.subr.mxu1 %v140_v33  ;;  %v138_v41 = vld [vmem:[%s1088_s1 + $0x3c0] sm:$0xff]  ;;  %v105_v44 = vld [vmem:[%s1088_s1 + $0x2b8] sm:$0xff] }
  0x31   :  { %v91_v38 = vld [vmem:[%s1088_s1 + $0x248] sm:$0xff]  ;;  %574 = vmatpush3.msra.mxu0 %v92_v34  ;;  %609 = vmatpush3.msra.mxu1 %v124_v35  ;;  %v90_v42 = vld [vmem:[%s1088_s1 + $0x240] sm:$0xff]  ;;  %v137_v45 = vld [vmem:[%s1088_s1 + $0x3b8] sm:$0xff] }
  0x32   :  { %v123_v39 = vld [vmem:[%s1088_s1 + $0x348] sm:$0xff]  ;;  %575 = vmatprep.subr.mxu0 %v107_v36  ;;  %610 = vmatprep.subr.mxu1 %v139_v37  ;;  %v122_v43 = vld [vmem:[%s1088_s1 + $0x340] sm:$0xff]  ;;  %v89_v46 = vld [vmem:[%s1088_s1 + $0x238] sm:$0xff] }
  0x33   :  { %576 = vmatpush3.msra.mxu0 %v91_v38  ;;  %611 = vmatpush3.msra.mxu1 %v123_v39  ;;  %v121_v47 = vld [vmem:[%s1088_s1 + $0x338] sm:$0xff]  ;;  %v104_v48 = vld [vmem:[%s1088_s1 + $0x2b0] sm:$0xff]  ;;  %v103_v53 = vld [vmem:[%s1088_s1 + $0x2a8] sm:$0xff] }
  0x34   :  { %577 = vmatprep.subr.mxu0 %v106_v40  ;;  %612 = vmatprep.subr.mxu1 %v138_v41  ;;  %v136_v49 = vld [vmem:[%s1088_s1 + $0x3b0] sm:$0xff]  ;;  %v135_v54 = vld [vmem:[%s1088_s1 + $0x3a8] sm:$0xff]  ;;  %v102_v58 = vld [vmem:[%s1088_s1 + $0x2a0] sm:$0xff] }
  0x35   :  { %578 = vmatpush3.msra.mxu0 %v90_v42  ;;  %613 = vmatpush3.msra.mxu1 %v122_v43  ;;  %v88_v50 = vld [vmem:[%s1088_s1 + $0x230] sm:$0xff]  ;;  %v17_v55 = vld [vmem:[%s1087_s0 + $0x8] sm:$0xff]  ;;  %v134_v59 = vld [vmem:[%s1088_s1 + $0x3a0] sm:$0xff] }
  0x36   :  { %579 = vmatprep.subr.mxu0 %v105_v44  ;;  %614 = vmatprep.subr.mxu1 %v137_v45  ;;  %v120_v52 = vld [vmem:[%s1088_s1 + $0x330] sm:$0xff]  ;;  %v87_v56 = vld [vmem:[%s1088_s1 + $0x228] sm:$0xff]  ;;  %v86_v60 = vld [vmem:[%s1088_s1 + $0x220] sm:$0xff]  ;;  %v167_v62 = vcombine.high %v17_v55, %v17_v55  ;;  %v174_v5 = vrot.slane %v17_v55, %v823_v51 }
  0x37   :  { %580 = vmatpush3.msra.mxu0 %v89_v46  ;;  %615 = vmatpush3.msra.mxu1 %v121_v47  ;;  %v119_v57 = vld [vmem:[%s1088_s1 + $0x328] sm:$0xff]  ;;  %v118_v61 = vld [vmem:[%s1088_s1 + $0x320] sm:$0xff]  ;;  %v101_v63 = vld [vmem:[%s1088_s1 + $0x298] sm:$0xff] }
  0x38   :  { %581 = vmatprep.subr.mxu0 %v104_v48  ;;  %616 = vmatprep.subr.mxu1 %v136_v49  ;;  %v133_v0 = vld [vmem:[%s1088_s1 + $0x398] sm:$0xff]  ;;  %v100_v3 = vld [vmem:[%s1088_s1 + $0x290] sm:$0xff]  ;;  %v181_v8 = vrot.slane %v167_v62, %v823_v51  ;;  %v99_v9 = vld [vmem:[%s1088_s1 + $0x288] sm:$0xff]  ;;  %v182_v14 = vcombine.high %v174_v5, %v174_v5 }
  0x39   :  { %582 = vmatpush3.msra.mxu0 %v88_v50  ;;  %617 = vmatpush3.msra.mxu1 %v120_v52  ;;  %v85_v1 = vld [vmem:[%s1088_s1 + $0x218] sm:$0xff]  ;;  %v132_v4 = vld [vmem:[%s1088_s1 + $0x390] sm:$0xff]  ;;  %v131_v10 = vld [vmem:[%s1088_s1 + $0x388] sm:$0xff] }
  0x3a   :  { %583 = vmatprep.subr.mxu0 %v103_v53  ;;  %618 = vmatprep.subr.mxu1 %v135_v54  ;;  %v117_v2 = vld [vmem:[%s1088_s1 + $0x318] sm:$0xff]  ;;  %v84_v6 = vld [vmem:[%s1088_s1 + $0x210] sm:$0xff]  ;;  %v83_v11 = vld [vmem:[%s1088_s1 + $0x208] sm:$0xff]  ;;  %v183_v16 = vcombine.high %v181_v8, %v181_v8 }
  0x3b   :  { %584 = vmatpush3.msra.mxu0 %v87_v56  ;;  %619 = vmatpush3.msra.mxu1 %v119_v57  ;;  %v116_v7 = vld [vmem:[%s1088_s1 + $0x310] sm:$0xff]  ;;  %v115_v51 = vld [vmem:[%s1088_s1 + $0x308] sm:$0xff]  ;;  %v98_v12 = vld [vmem:[%s1088_s1 + $0x280] sm:$0xff] }
  0x3c   :  { %585 = vmatprep.subr.mxu0 %v102_v58  ;;  %620 = vmatprep.subr.mxu1 %v134_v59  ;;  %v130_v13 = vld [vmem:[%s1088_s1 + $0x380] sm:$0xff] }
  0x3d   :  { %586 = vmatpush3.msra.mxu0 %v86_v60  ;;  %621 = vmatpush3.msra.mxu1 %v118_v61  ;;  %v82_v15 = vld [vmem:[%s1088_s1 + $0x200] sm:$0xff] }
  0x3e   :  { %587 = vmatprep.subr.mxu0 %v101_v63  ;;  %622 = vmatprep.subr.mxu1 %v133_v0  ;;  %v114_v17 = vld [vmem:[%s1088_s1 + $0x300] sm:$0xff]  ;;  %s664_s1 = smov [#allocation3]  }
  0x3f   :  { %588 = vmatpush3.msra.mxu0 %v85_v1  ;;  %623 = vmatpush3.msra.mxu1 %v117_v2  ;;  %s485_s2 = sshll.u32 %s664_s1, 4  ;;  %s486_s2 = int_to_ptr.vmem [resolvable:$true] %s485_s2 }
  0x40   :  { %589 = vmatprep.subr.mxu0 %v100_v3  ;;  %624 = vmatprep.subr.mxu1 %v132_v4  ;;  %s641_s29 = scalar_lea.vmem %s486_s2, 32  ;;  %p646_p1 = scmp.lt.s32.totalorder %s486_s2, %s486_s2 }
  0x41   :  { %590 = vmatpush3.msra.mxu0 %v84_v6  ;;  %625 = vmatpush3.msra.mxu1 %v116_v7  ;;  %p642_p0 = scmp.ne.s32.totalorder %s486_s2, %s641_s29  ;;  %p647_p2 = scmp.lt.s32.totalorder %s641_s29, %s641_s29 }
  0x42   :  { %591 = vmatprep.subr.mxu0 %v99_v9  ;;  %626 = vmatprep.subr.mxu1 %v131_v10 }
  0x43   :  { %592 = vmatpush3.msra.mxu0 %v83_v11  ;;  %627 = vmatpush3.msra.mxu1 %v115_v51  ;;  %p648_p3 = por %p647_p2, %p646_p1 }
  0x44   :  { %593 = vmatprep.subr.mxu0 %v98_v12  ;;  %628 = vmatprep.subr.mxu1 %v130_v13 }
  0x45   :  { %594 = vmatpush3.msra.mxu0 %v82_v15  ;;  %396 = vmatprep.mubr.f32.mxu0 %v182_v14  ;;  %p649_p4 = pnand %p648_p3, %p642_p0 }
  0x46   :  { %629 = vmatpush3.msra.mxu1 %v114_v17  ;;  %466 = vmatprep.mubr.f32.mxu1 %v183_v16 }
  0x47   :  { %397 = vmatmul.mubr.f32.vlgmr.msra.gmra.mxu0 %v174_v5  ;;  %467 = vmatmul.mubr.f32.vlgmr.msra.gmra.mxu1 %v181_v8 }
  0xe4   :  { %v525_v18 = vpop.f32.mrf.mxu0 }
  0xe6   :  { %v560_v19 = vpop.f32.mrf.mxu1  ;;  %v526_v20 = vpop.f32.mrf.mxu0 }
  0xe7   :  { %v527_v21 = vadd.f32 %v526_v20, %v525_v18 }
  0xe8   :  { %v561_v23 = vpop.f32.mrf.mxu1 }
  0xe9   :  { %v259_v24 = vadd.f32 %v527_v21, %v147_v22  ;;  %v562_v25 = vadd.f32 %v561_v23, %v560_v19 }
  0xeb   :  { %v329_v30 = vadd.f32 %v562_v25, %v259_v24 }
 0x107   :  { %v595_v26 = vpop.f32.mrf.mxu0  ;;  %v630_v27 = vpop.f32.mrf.mxu1 }
 0x109   :  { %v596_v28 = vpop.f32.mrf.mxu0  ;;  %v631_v29 = vpop.f32.mrf.mxu1 }
 0x10a   :  { %v597_v31 = vadd.f32 %v596_v28, %v595_v26  ;;  %v632_v33 = vadd.f32 %v631_v29, %v630_v27 }
 0x10c   :  { %v399_v32 = vadd.f32 %v597_v31, %v329_v30 }
 0x10e   :  { %v469_v34 = vadd.f32 %v632_v33, %v399_v32 }
 0x110   :  { %v472_v35 = vsub.f32 0.0, %v469_v34 }
 0x112   :  { %v473_v36 = vmul.f32 1.442695, %v472_v35 }
 0x114   :  { %637 = vpow2.f32 %v473_v36 }
 0x121   :  { %v638_v37 = vpop.eup %637 }
 0x122   :  { %v475_v38 = vadd.f32 1.0, %v638_v37 }
 0x124   :  { %639 = vrcp.f32 %v475_v38 }
 0x131   :  { %v640_v39 = vpop.eup %639 }
 0x132   :  { %478 = vst.msk [vmem:[#allocation3] sm:$0x3] %vm477_vm0, %v640_v39 }
 0x133   :  { %652 = shalt.err (!%p649_p4)
}
 0x134   :  { %488 = dma.vmem_to_hbm [thread:$0]  %s486_s2, 32, %s1090_s3, [#allocation4]  }
 0x135   :  { %661 = dma.done.wait [#allocation4], 32  }
 0x136   :  { %662 = vsyncadd [#allocation4], 4294967264 }
 0x137   :  { %492 = vsyncpa [#allocation4], 1 }

</bundles_post_ra>
